<compile_context>
chip_gen: v6e
topology: v6e:2x2x1
jax: 0.10.0
libtpu: 0.0.40
codegen_flags: <defaults>
</compile_context>

<pallas_src>
import functools

import jax
import jax.numpy as jnp
from jax.experimental import pallas as pl
from jax.experimental.pallas import tpu as pltpu


# ----------------------------------------------------------------------------
# Parameter / positional-code construction (plain JAX, deterministic)
# ----------------------------------------------------------------------------
def sine_position_coding(dims=32, max_length=300, freq_factor=2):
    time = jnp.arange(0, max_length, 1, dtype=jnp.float32)
    freq_factors = freq_factor * jnp.arange(1, dims + 1, 1, dtype=jnp.float32)
    codes = jnp.sin(2.0 * jnp.pi * jnp.outer(time, freq_factors) / max_length)
    return codes.astype(jnp.float32)  # (max_length, dims)


def xavier_normal(key, shape):
    # torch.nn.init.xavier_normal_ on an (H, fan_in-ish, fan_out-ish) tensor.
    receptive = 1
    for d in shape[2:]:
        receptive *= d
    fan_in = shape[1] * receptive
    fan_out = shape[0] * receptive
    std = (2.0 / (fan_in + fan_out)) ** 0.5
    return std * jax.random.normal(key, shape, dtype=jnp.float32)


# ----------------------------------------------------------------------------
# Pallas kernel: one batch element per grid step, ALL heads fused per step
# ----------------------------------------------------------------------------
def _mhsa_kernel(seq_ref, pos_ref, mq_ref, mk_ref, wq_ref, wk_ref, wv_ref,
                 out_ref, *, heads, inv_temp, matmul_dtype, apply_mask):
    vin = seq_ref[0]                       # (L, D)  raw sequence (values input)
    kq = vin + pos_ref[...]                # (L, D)  queries == keys input

    hk = wq_ref.shape[1]                   # H * K
    hv = wv_ref.shape[1]                   # H * V
    kd = hk // heads
    vd = hv // heads

    # --- head-fused projections: one wide MXU matmul each -------------------
    kq_c = kq.astype(matmul_dtype)
    wq = wq_ref[...].astype(matmul_dtype)
    wk = wk_ref[...].astype(matmul_dtype)
    wv = wv_ref[...].astype(matmul_dtype)

    # fold 1/temperature into q (constant multiply, avoids dividing rel)
    q = jnp.dot(kq_c, wq, preferred_element_type=jnp.float32) * inv_temp  # (L, H*K)
    k = jnp.dot(kq_c, wk, preferred_element_type=jnp.float32)             # (L, H*K)
    v = jnp.dot(vin.astype(matmul_dtype), wv,
                preferred_element_type=jnp.float32)                       # (L, H*V)

    if apply_mask:
        mq = mq_ref[0]                     # (L, 1)  mask, query orientation
        mk = mk_ref[0]                     # (1, L)  mask, key orientation
        # additive bias: 0 where both query & key valid, -1e30 otherwise.
        # Large finite (not -inf) so fully-masked rows never produce NaNs.
        bias = (mq * mk - 1.0) * 1e30      # (L, L)  computed once per block

    outs = []
    for h in range(heads):                 # static unroll over heads
        qh = q[:, h * kd:(h + 1) * kd]     # (L, K)  static lane slice
        kh = k[:, h * kd:(h + 1) * kd]     # (L, K)
        vh = v[:, h * vd:(h + 1) * vd]     # (L, V)

        # relevance[q, l] = <q_q, k_l> / temperature  (scale already folded)
        rel = jax.lax.dot_general(
            qh, kh, (((1,), (1,)), ((), ())),
            preferred_element_type=jnp.float32)                           # (Q, L)
        if apply_mask:
            rel = rel + bias

        # softmax over the key axis (all VPU/EUP math in f32)
        mx = jnp.max(rel, axis=-1, keepdims=True)
        p = jnp.exp(rel - mx)              # masked keys underflow to exact 0
        denom = jnp.sum(p, axis=-1, keepdims=True)
        scale = pl.reciprocal(denom, approx=True)                         # EUP
        if apply_mask:
            # zero fully-masked query rows (matches PyTorch masked_fill(0))
            scale = scale * mq
        p = p * scale

        outs.append(jnp.dot(p.astype(matmul_dtype), vh.astype(matmul_dtype),
                            preferred_element_type=jnp.float32))          # (Q, V)

    # single lane-dense (L, H*V) store; wrapper reshape to (B, L, H, V) is free
    out_ref[0] = jnp.concatenate(outs, axis=-1).astype(out_ref.dtype)


def multi_head_self_attention(sequence, pos_codes, wq, wk, wv, mask=None,
                              temperature=None, matmul_dtype=jnp.float32):
    """sequence: (B, L, in_size); mask: (B, L) or None.
    Returns (B, L, H, out_size) exactly like the PyTorch module."""
    B, L, D = sequence.shape
    H, _, K = wq.shape
    V = wv.shape[-1]
    if temperature is None:
        # module default: in_query_size ** 0.5 == sqrt(in_size)
        temperature = float(D) ** 0.5
    inv_temp = 1.0 / float(temperature)

    sequence = sequence.astype(jnp.float32)
    pos = pos_codes[:L].astype(jnp.float32)                  # (L, D)

    apply_mask = mask is not None
    if mask is None:
        mask = jnp.ones((B, L), dtype=jnp.float32)
    mask = mask.astype(jnp.float32)
    mask_q = mask[:, :, None]                                # (B, L, 1)
    mask_k = mask[:, None, :]                                # (B, 1, L)

    # fuse heads into the weight minor dim: (H, D, K) -> (D, H*K)
    wq_f = jnp.transpose(wq, (1, 0, 2)).reshape(D, H * K).astype(jnp.float32)
    wk_f = jnp.transpose(wk, (1, 0, 2)).reshape(D, H * K).astype(jnp.float32)
    wv_f = jnp.transpose(wv, (1, 0, 2)).reshape(D, H * V).astype(jnp.float32)

    out_flat = pl.pallas_call(
        functools.partial(_mhsa_kernel, heads=H, inv_temp=inv_temp,
                          matmul_dtype=matmul_dtype, apply_mask=apply_mask),
        out_shape=jax.ShapeDtypeStruct((B, L, H * V), jnp.float32),
        grid_spec=pltpu.PrefetchScalarGridSpec(
            num_scalar_prefetch=0,
            grid=(B,),                                        # one batch / step
            in_specs=[
                pl.BlockSpec((1, L, D), lambda b: (b, 0, 0)),   # sequence
                pl.BlockSpec((L, D), lambda b: (0, 0)),         # position codes
                pl.BlockSpec((1, L, 1), lambda b: (b, 0, 0)),   # mask (q side)
                pl.BlockSpec((1, 1, L), lambda b: (b, 0, 0)),   # mask (k side)
                pl.BlockSpec((D, H * K), lambda b: (0, 0)),     # Wq fused
                pl.BlockSpec((D, H * K), lambda b: (0, 0)),     # Wk fused
                pl.BlockSpec((D, H * V), lambda b: (0, 0)),     # Wv fused
            ],
            out_specs=pl.BlockSpec((1, L, H * V), lambda b: (b, 0, 0)),
        ),
        compiler_params=pltpu.CompilerParams(
            dimension_semantics=("parallel",)),
    )(sequence, pos, mask_q, mask_k, wq_f, wk_f, wv_f)

    # (B, L, H*V) -> (B, L, H, V): trailing-dim reshape, no transpose / HBM pass
    return out_flat.reshape(B, L, H, V)


# ----------------------------------------------------------------------------
# Pure-JAX reference (mirrors the PyTorch einsums) for verification
# ----------------------------------------------------------------------------
def reference(sequence, pos_codes, wq, wk, wv, mask=None, temperature=None):
    B, L, D = sequence.shape
    if temperature is None:
        temperature = float(D) ** 0.5
    kq = sequence + pos_codes[:L][None]
    pq = jnp.einsum('bqi,hik->bqhk', kq, wq)
    pk = jnp.einsum('bli,hik->blhk', kq, wk)
    pv = jnp.einsum('bli,hiv->blhv', sequence, wv)
    rel = jnp.einsum('bqhk,blhk->blqh', pq, pk) / temperature
    if mask is not None:
        m = jnp.einsum('bl,bq->blq', mask, mask)[..., None]
        rel = jnp.where(m == 0, -jnp.inf, rel)
    p = jax.nn.softmax(rel, axis=1)
    if mask is not None:
        p = jnp.where(m == 0, 0.0, p)
    return jnp.einsum('blhv,blqh->bqhv', pv, p)


if __name__ == "__main__":
    B, L = 2, 8
    in_size, out_size, heads = 32, 16, 4
    max_length = 64

    key = jax.random.PRNGKey(0)
    k_seq, k_wq, k_wk, k_wv = jax.random.split(key, 4)

    sequence = jax.random.normal(k_seq, (B, L, in_size), dtype=jnp.float32)
    pos_codes = sine_position_coding(in_size, max_length=max_length)
    wq = xavier_normal(k_wq, (heads, in_size, out_size))
    wk = xavier_normal(k_wk, (heads, in_size, out_size))
    wv = xavier_normal(k_wv, (heads, in_size, out_size))

    # no-mask path (mask=None in the PyTorch forward)
    out = multi_head_self_attention(sequence, pos_codes, wq, wk, wv, mask=None)
    out = jax.block_until_ready(out)
    ref = reference(sequence, pos_codes, wq, wk, wv, mask=None)
    assert out.shape == (B, L, heads, out_size)
    assert jnp.allclose(out, ref, rtol=5e-3, atol=5e-3), \
        float(jnp.max(jnp.abs(out - ref)))

    # masked path (padding on batch 0, including fully-masked query rows)
    mask = jnp.array([[1, 1, 1, 1, 1, 1, 0, 0],
                      [1, 1, 1, 1, 1, 1, 1, 1]], dtype=jnp.float32)
    out_m = multi_head_self_attention(sequence, pos_codes, wq, wk, wv, mask=mask)
    out_m = jax.block_until_ready(out_m)
    ref_m = reference(sequence, pos_codes, wq, wk, wv, mask=mask)
    assert jnp.allclose(out_m, ref_m, rtol=5e-3, atol=5e-3), \
        float(jnp.max(jnp.abs(out_m - ref_m)))

    # bf16 MXU path (recommended on v6e/v7x; softmax stays f32 inside kernel)
    out_bf = multi_head_self_attention(sequence, pos_codes, wq, wk, wv,
                                       mask=mask, matmul_dtype=jnp.bfloat16)
    out_bf = jax.block_until_ready(out_bf)
    assert jnp.allclose(out_bf, ref_m, rtol=5e-2, atol=5e-2), \
        float(jnp.max(jnp.abs(out_bf - ref_m)))

    print("KERNEL_OK")
</pallas_src>

<mosaic_0001>
module attributes {stable_mosaic.version = 11 : i64} {
  func.func @_mhsa_kernel(%arg0: i32, %arg1: memref<1x8x32xf32, #tpu.memory_space<vmem>>, %arg2: memref<8x32xf32, #tpu.memory_space<vmem>>, %arg3: memref<1x8x1xf32, #tpu.memory_space<vmem>>, %arg4: memref<1x1x8xf32, #tpu.memory_space<vmem>>, %arg5: memref<32x64xf32, #tpu.memory_space<vmem>>, %arg6: memref<32x64xf32, #tpu.memory_space<vmem>>, %arg7: memref<32x64xf32, #tpu.memory_space<vmem>>, %arg8: memref<1x8x64xf32, #tpu.memory_space<vmem>>) attributes {dimension_semantics = [#tpu.dimension_semantics<parallel>], iteration_bounds = array<i64: 2>, scalar_prefetch = 0 : i64, scratch_operands = 0 : i64, tpu.core_type = #tpu.core_type<tc>, window_params = [{transform_indices = @transform_0, window_bounds = array<i64: 1, 8, 32>}, {pipeline_mode = #tpu.pipeline_mode<synchronous>, transform_indices = @transform_1, window_bounds = array<i64: 8, 32>}, {transform_indices = @transform_2, window_bounds = array<i64: 1, 8, 1>}, {transform_indices = @transform_3, window_bounds = array<i64: 1, 1, 8>}, {pipeline_mode = #tpu.pipeline_mode<synchronous>, transform_indices = @transform_4, window_bounds = array<i64: 32, 64>}, {pipeline_mode = #tpu.pipeline_mode<synchronous>, transform_indices = @transform_5, window_bounds = array<i64: 32, 64>}, {pipeline_mode = #tpu.pipeline_mode<synchronous>, transform_indices = @transform_6, window_bounds = array<i64: 32, 64>}, {transform_indices = @transform_7, window_bounds = array<i64: 1, 8, 64>}]} {
    %c0 = arith.constant 0 : index
    %c0_0 = arith.constant 0 : index
    %c0_1 = arith.constant 0 : index
    %0 = vector.load %arg1[%c0, %c0_0, %c0_1] : memref<1x8x32xf32, #tpu.memory_space<vmem>>, vector<1x8x32xf32>
    %1 = vector.shape_cast %0 : vector<1x8x32xf32> to vector<8x32xf32>
    %c0_2 = arith.constant 0 : index
    %c0_3 = arith.constant 0 : index
    %2 = vector.load %arg2[%c0_2, %c0_3] : memref<8x32xf32, #tpu.memory_space<vmem>>, vector<8x32xf32>
    %3 = arith.addf %1, %2 : vector<8x32xf32>
    %c0_4 = arith.constant 0 : index
    %c0_5 = arith.constant 0 : index
    %4 = vector.load %arg5[%c0_4, %c0_5] : memref<32x64xf32, #tpu.memory_space<vmem>>, vector<32x64xf32>
    %c0_6 = arith.constant 0 : index
    %c0_7 = arith.constant 0 : index
    %5 = vector.load %arg6[%c0_6, %c0_7] : memref<32x64xf32, #tpu.memory_space<vmem>>, vector<32x64xf32>
    %c0_8 = arith.constant 0 : index
    %c0_9 = arith.constant 0 : index
    %6 = vector.load %arg7[%c0_8, %c0_9] : memref<32x64xf32, #tpu.memory_space<vmem>>, vector<32x64xf32>
    %cst = arith.constant dense<0.000000e+00> : vector<8x64xf32>
    %7 = tpu.matmul %3, %4, %cst {dimension_numbers = #tpu.dot_dimension_numbers<[1], [0], [0], [1], [0, 0, 1, 1], [], []>} : vector<8x32xf32>, vector<32x64xf32>, vector<8x64xf32> -> vector<8x64xf32>
    %cst_10 = arith.constant 0.176776692 : f32
    %8 = vector.broadcast %cst_10 : f32 to vector<8x64xf32>
    %9 = arith.mulf %7, %8 : vector<8x64xf32>
    %cst_11 = arith.constant dense<0.000000e+00> : vector<8x64xf32>
    %10 = tpu.matmul %3, %5, %cst_11 {dimension_numbers = #tpu.dot_dimension_numbers<[1], [0], [0], [1], [0, 0, 1, 1], [], []>} : vector<8x32xf32>, vector<32x64xf32>, vector<8x64xf32> -> vector<8x64xf32>
    %cst_12 = arith.constant dense<0.000000e+00> : vector<8x64xf32>
    %11 = tpu.matmul %1, %6, %cst_12 {dimension_numbers = #tpu.dot_dimension_numbers<[1], [0], [0], [1], [0, 0, 1, 1], [], []>} : vector<8x32xf32>, vector<32x64xf32>, vector<8x64xf32> -> vector<8x64xf32>
    %12 = vector.extract_strided_slice %9 {offsets = [0, 0], sizes = [8, 16], strides = [1, 1]} : vector<8x64xf32> to vector<8x16xf32>
    %13 = vector.extract_strided_slice %10 {offsets = [0, 0], sizes = [8, 16], strides = [1, 1]} : vector<8x64xf32> to vector<8x16xf32>
    %14 = vector.extract_strided_slice %11 {offsets = [0, 0], sizes = [8, 16], strides = [1, 1]} : vector<8x64xf32> to vector<8x16xf32>
    %cst_13 = arith.constant dense<0.000000e+00> : vector<8x8xf32>
    %15 = tpu.matmul %12, %13, %cst_13 {dimension_numbers = #tpu.dot_dimension_numbers<[1], [1], [0], [0], [0, 0, 1, 0], [], []>} : vector<8x16xf32>, vector<8x16xf32>, vector<8x8xf32> -> vector<8x8xf32>
    %cst_14 = arith.constant dense<0xFF800000> : vector<8xf32>
    %16 = vector.multi_reduction <maximumf>, %15, %cst_14 [1] : vector<8x8xf32> to vector<8xf32>
    %17 = vector.shape_cast %16 : vector<8xf32> to vector<8x1xf32>
    %18 = vector.broadcast %17 : vector<8x1xf32> to vector<8x8xf32>
    %19 = arith.subf %15, %18 : vector<8x8xf32>
    %20 = math.exp %19 : vector<8x8xf32>
    %cst_15 = arith.constant dense<0.000000e+00> : vector<8xf32>
    %21 = vector.multi_reduction <add>, %20, %cst_15 [1] : vector<8x8xf32> to vector<8xf32>
    %22 = vector.shape_cast %21 : vector<8xf32> to vector<8x1xf32>
    %23 = tpu.reciprocal %22 {approx = true} : vector<8x1xf32> -> vector<8x1xf32>
    %24 = vector.broadcast %23 : vector<8x1xf32> to vector<8x8xf32>
    %25 = arith.mulf %20, %24 : vector<8x8xf32>
    %cst_16 = arith.constant dense<0.000000e+00> : vector<8x16xf32>
    %26 = tpu.matmul %25, %14, %cst_16 {dimension_numbers = #tpu.dot_dimension_numbers<[1], [0], [0], [1], [0, 0, 1, 1], [], []>} : vector<8x8xf32>, vector<8x16xf32>, vector<8x16xf32> -> vector<8x16xf32>
    %27 = vector.extract_strided_slice %9 {offsets = [0, 16], sizes = [8, 16], strides = [1, 1]} : vector<8x64xf32> to vector<8x16xf32>
    %28 = vector.extract_strided_slice %10 {offsets = [0, 16], sizes = [8, 16], strides = [1, 1]} : vector<8x64xf32> to vector<8x16xf32>
    %29 = vector.extract_strided_slice %11 {offsets = [0, 16], sizes = [8, 16], strides = [1, 1]} : vector<8x64xf32> to vector<8x16xf32>
    %cst_17 = arith.constant dense<0.000000e+00> : vector<8x8xf32>
    %30 = tpu.matmul %27, %28, %cst_17 {dimension_numbers = #tpu.dot_dimension_numbers<[1], [1], [0], [0], [0, 0, 1, 0], [], []>} : vector<8x16xf32>, vector<8x16xf32>, vector<8x8xf32> -> vector<8x8xf32>
    %cst_18 = arith.constant dense<0xFF800000> : vector<8xf32>
    %31 = vector.multi_reduction <maximumf>, %30, %cst_18 [1] : vector<8x8xf32> to vector<8xf32>
    %32 = vector.shape_cast %31 : vector<8xf32> to vector<8x1xf32>
    %33 = vector.broadcast %32 : vector<8x1xf32> to vector<8x8xf32>
    %34 = arith.subf %30, %33 : vector<8x8xf32>
    %35 = math.exp %34 : vector<8x8xf32>
    %cst_19 = arith.constant dense<0.000000e+00> : vector<8xf32>
    %36 = vector.multi_reduction <add>, %35, %cst_19 [1] : vector<8x8xf32> to vector<8xf32>
    %37 = vector.shape_cast %36 : vector<8xf32> to vector<8x1xf32>
    %38 = tpu.reciprocal %37 {approx = true} : vector<8x1xf32> -> vector<8x1xf32>
    %39 = vector.broadcast %38 : vector<8x1xf32> to vector<8x8xf32>
    %40 = arith.mulf %35, %39 : vector<8x8xf32>
    %cst_20 = arith.constant dense<0.000000e+00> : vector<8x16xf32>
    %41 = tpu.matmul %40, %29, %cst_20 {dimension_numbers = #tpu.dot_dimension_numbers<[1], [0], [0], [1], [0, 0, 1, 1], [], []>} : vector<8x8xf32>, vector<8x16xf32>, vector<8x16xf32> -> vector<8x16xf32>
    %42 = vector.extract_strided_slice %9 {offsets = [0, 32], sizes = [8, 16], strides = [1, 1]} : vector<8x64xf32> to vector<8x16xf32>
    %43 = vector.extract_strided_slice %10 {offsets = [0, 32], sizes = [8, 16], strides = [1, 1]} : vector<8x64xf32> to vector<8x16xf32>
    %44 = vector.extract_strided_slice %11 {offsets = [0, 32], sizes = [8, 16], strides = [1, 1]} : vector<8x64xf32> to vector<8x16xf32>
    %cst_21 = arith.constant dense<0.000000e+00> : vector<8x8xf32>
    %45 = tpu.matmul %42, %43, %cst_21 {dimension_numbers = #tpu.dot_dimension_numbers<[1], [1], [0], [0], [0, 0, 1, 0], [], []>} : vector<8x16xf32>, vector<8x16xf32>, vector<8x8xf32> -> vector<8x8xf32>
    %cst_22 = arith.constant dense<0xFF800000> : vector<8xf32>
    %46 = vector.multi_reduction <maximumf>, %45, %cst_22 [1] : vector<8x8xf32> to vector<8xf32>
    %47 = vector.shape_cast %46 : vector<8xf32> to vector<8x1xf32>
    %48 = vector.broadcast %47 : vector<8x1xf32> to vector<8x8xf32>
    %49 = arith.subf %45, %48 : vector<8x8xf32>
    %50 = math.exp %49 : vector<8x8xf32>
    %cst_23 = arith.constant dense<0.000000e+00> : vector<8xf32>
    %51 = vector.multi_reduction <add>, %50, %cst_23 [1] : vector<8x8xf32> to vector<8xf32>
    %52 = vector.shape_cast %51 : vector<8xf32> to vector<8x1xf32>
    %53 = tpu.reciprocal %52 {approx = true} : vector<8x1xf32> -> vector<8x1xf32>
    %54 = vector.broadcast %53 : vector<8x1xf32> to vector<8x8xf32>
    %55 = arith.mulf %50, %54 : vector<8x8xf32>
    %cst_24 = arith.constant dense<0.000000e+00> : vector<8x16xf32>
    %56 = tpu.matmul %55, %44, %cst_24 {dimension_numbers = #tpu.dot_dimension_numbers<[1], [0], [0], [1], [0, 0, 1, 1], [], []>} : vector<8x8xf32>, vector<8x16xf32>, vector<8x16xf32> -> vector<8x16xf32>
    %57 = vector.extract_strided_slice %9 {offsets = [0, 48], sizes = [8, 16], strides = [1, 1]} : vector<8x64xf32> to vector<8x16xf32>
    %58 = vector.extract_strided_slice %10 {offsets = [0, 48], sizes = [8, 16], strides = [1, 1]} : vector<8x64xf32> to vector<8x16xf32>
    %59 = vector.extract_strided_slice %11 {offsets = [0, 48], sizes = [8, 16], strides = [1, 1]} : vector<8x64xf32> to vector<8x16xf32>
    %cst_25 = arith.constant dense<0.000000e+00> : vector<8x8xf32>
    %60 = tpu.matmul %57, %58, %cst_25 {dimension_numbers = #tpu.dot_dimension_numbers<[1], [1], [0], [0], [0, 0, 1, 0], [], []>} : vector<8x16xf32>, vector<8x16xf32>, vector<8x8xf32> -> vector<8x8xf32>
    %cst_26 = arith.constant dense<0xFF800000> : vector<8xf32>
    %61 = vector.multi_reduction <maximumf>, %60, %cst_26 [1] : vector<8x8xf32> to vector<8xf32>
    %62 = vector.shape_cast %61 : vector<8xf32> to vector<8x1xf32>
    %63 = vector.broadcast %62 : vector<8x1xf32> to vector<8x8xf32>
    %64 = arith.subf %60, %63 : vector<8x8xf32>
    %65 = math.exp %64 : vector<8x8xf32>
    %cst_27 = arith.constant dense<0.000000e+00> : vector<8xf32>
    %66 = vector.multi_reduction <add>, %65, %cst_27 [1] : vector<8x8xf32> to vector<8xf32>
    %67 = vector.shape_cast %66 : vector<8xf32> to vector<8x1xf32>
    %68 = tpu.reciprocal %67 {approx = true} : vector<8x1xf32> -> vector<8x1xf32>
    %69 = vector.broadcast %68 : vector<8x1xf32> to vector<8x8xf32>
    %70 = arith.mulf %65, %69 : vector<8x8xf32>
    %cst_28 = arith.constant dense<0.000000e+00> : vector<8x16xf32>
    %71 = tpu.matmul %70, %59, %cst_28 {dimension_numbers = #tpu.dot_dimension_numbers<[1], [0], [0], [1], [0, 0, 1, 1], [], []>} : vector<8x8xf32>, vector<8x16xf32>, vector<8x16xf32> -> vector<8x16xf32>
    %72 = tpu.concatenate %26, %41, %56, %71 in 1 : vector<8x16xf32>, vector<8x16xf32>, vector<8x16xf32>, vector<8x16xf32> -> vector<8x64xf32>
    %c0_29 = arith.constant 0 : index
    %c0_30 = arith.constant 0 : index
    %c0_31 = arith.constant 0 : index
    %73 = vector.load %arg8[%c0_29, %c0_30, %c0_31] : memref<1x8x64xf32, #tpu.memory_space<vmem>>, vector<1x8x64xf32>
    %74 = vector.shape_cast %73 : vector<1x8x64xf32> to vector<8x64xf32>
    %75 = vector.shape_cast %72 : vector<8x64xf32> to vector<1x8x64xf32>
    tpu.vector_store %arg8[%c0_29, %c0_30, %c0_31], %75 {strides = array<i32>} : memref<1x8x64xf32, #tpu.memory_space<vmem>>, vector<1x8x64xf32>,
    return
  }
  func.func @transform_0(%arg0: i32) -> (i32, i32, i32) {
    %c0_i32 = arith.constant 0 : i32
    %c0_i32_0 = arith.constant 0 : i32
    %c0_i32_1 = arith.constant 0 : i32
    return %arg0, %c0_i32, %c0_i32_0 : i32, i32, i32
  }
  func.func @transform_1(%arg0: i32) -> (i32, i32) {
    %c0_i32 = arith.constant 0 : i32
    %c0_i32_0 = arith.constant 0 : i32
    %c0_i32_1 = arith.constant 0 : i32
    return %c0_i32, %c0_i32_0 : i32, i32
  }
  func.func @transform_2(%arg0: i32) -> (i32, i32, i32) {
    %c0_i32 = arith.constant 0 : i32
    %c0_i32_0 = arith.constant 0 : i32
    %c0_i32_1 = arith.constant 0 : i32
    return %arg0, %c0_i32, %c0_i32_0 : i32, i32, i32
  }
  func.func @transform_3(%arg0: i32) -> (i32, i32, i32) {
    %c0_i32 = arith.constant 0 : i32
    %c0_i32_0 = arith.constant 0 : i32
    %c0_i32_1 = arith.constant 0 : i32
    return %arg0, %c0_i32, %c0_i32_0 : i32, i32, i32
  }
  func.func @transform_4(%arg0: i32) -> (i32, i32) {
    %c0_i32 = arith.constant 0 : i32
    %c0_i32_0 = arith.constant 0 : i32
    %c0_i32_1 = arith.constant 0 : i32
    return %c0_i32, %c0_i32_0 : i32, i32
  }
  func.func @transform_5(%arg0: i32) -> (i32, i32) {
    %c0_i32 = arith.constant 0 : i32
    %c0_i32_0 = arith.constant 0 : i32
    %c0_i32_1 = arith.constant 0 : i32
    return %c0_i32, %c0_i32_0 : i32, i32
  }
  func.func @transform_6(%arg0: i32) -> (i32, i32) {
    %c0_i32 = arith.constant 0 : i32
    %c0_i32_0 = arith.constant 0 : i32
    %c0_i32_1 = arith.constant 0 : i32
    return %c0_i32, %c0_i32_0 : i32, i32
  }
  func.func @transform_7(%arg0: i32) -> (i32, i32, i32) {
    %c0_i32 = arith.constant 0 : i32
    %c0_i32_0 = arith.constant 0 : i32
    %c0_i32_1 = arith.constant 0 : i32
    return %arg0, %c0_i32, %c0_i32_0 : i32, i32, i32
  }
}

</mosaic_0001>

<bundles_post_ra>
// kernel: tpu_custom_call.1
= control target key start
LH: loop header
LB: loop body
LE: loop exit
PB: predicated region body
PF: predicated region fallthrough
CT: control target
= control target key end

     0   :  { %12 = vsyncpa [#allocation3], 0  ;;  %s2127_s0 = inlined_call_operand.vmem [shape: f32[2,8,32], index: 0, kind: input, shape index: {}]   ;;  %s2128_s1 = inlined_call_operand.hbm [shape: f32[8,32], index: 1, kind: input, shape index: {}]   ;;  %s2129_s2 = inlined_call_operand.vmem [shape: f32[2,8,1], index: 2, kind: input, shape index: {}]   ;;  %s2130_s3 = inlined_call_operand.vmem [shape: f32[2,1,8], index: 3, kind: input, shape index: {}]   ;;  %s2131_s4 = inlined_call_operand.hbm [shape: f32[32,64], index: 4, kind: input, shape index: {}]   ;;  %s2132_s5 = inlined_call_operand.hbm [shape: f32[32,64], index: 5, kind: input, shape index: {}]   ;;  %s2133_s6 = inlined_call_operand.hbm [shape: f32[32,64], index: 6, kind: input, shape index: {}]   ;;  %s2134_s7 = inlined_call_operand.hbm [shape: f32[2,8,64], index: 7, kind: output, shape index: {}]  }
   0x1   :  { %13 = vsyncpa [#allocation6], 0 }
   0x2   :  { %14 = vsyncpa [#allocation9], 0 }
   0x3   :  { %15 = vsyncpa [#allocation4], 0 }
   0x4   :  { %17 = vsyncpa [#allocation4 + $0x1], 0  ;;  %s1882_s2 = smov 0   ;;  %s1884_s3 = smov 0  }
   0x5   :  { %s1886_s24 = smov 0   ;;  %s1888_s25 = smov 0  }
   0x6 LB: > { %s1903_s26 = sadd.s32 4294967295, %s1825_s25   ;;  %s1406_s27 = sadd.s32 4294967294, %s1825_s25   ;;  %s1825_s25 = sphi %s1888_s25, %s2152_s25   ;;  %s1821_s24 = sphi %s1886_s24, %s2151_s24   ;;  %s1817_s3 = sphi %s1884_s3, %s2150_s3   ;;  %s1813_s2 = sphi %s1882_s2, %s2149_s2  }
   0x7   : > { %s1907_s28 = sadd.s32 1, %s1825_s25   ;;  %s192_s29 = sadd.s32 1, %s1821_s24 }
   0x8   : > { %s189_s30 = ssub.s32 %s1825_s25, %s1907_s28  ;;  %p202_p0 = scmp.ne.s32.totalorder %s1821_s24, %s1817_s3 }
   0x9   : > { %p190_p1 = scmp.eq.s32.totalorder %s189_s30, 0  ;;  %p203_p2 = scmp.eq.s32.totalorder %s1903_s26, 1 }
   0xa   : > { %p208_p3 = scmp.ne.s32.totalorder %s1817_s3, %s1813_s2  ;;  %p209_p4 = scmp.eq.s32.totalorder %s1406_s27, 1 }
   0xb   : > { %s1918_s8 = scalar_select %p190_p1, %s1821_s24, %s192_s29  }
   0xc   : > { %p1920_p5 = por %p203_p2, %p202_p0  ;;  %p1924_p6 = por %p209_p4, %p208_p3 }
   0xd   : > { %p1407_p7 = scmp.ge.s32.totalorder %s1825_s25, 1  ;;  %p216_p8 = scmp.lt.s32.totalorder %s1825_s25, 3 }
   0xe   : > { %s2137_s9 = scalar_select %p1920_p5, 1, 0 }
   0xf   : > { %s2138_s10 = scalar_select %p1924_p6, 1, 0 }
  0x10   : > { %p2135_p9 = scmp.eq.s32.totalorder %s1903_s26, 0  ;;  %p1931_p10 = pnand %p1407_p7, %p216_p8 }
  0x11   : > { %s1827_s12 = smov [#allocation5]   ;;  %s1828_s15 = smov [#allocation2]  }
  0x12   : > { %s239_s13 = sshll.u32 %s1827_s12, 4  ;;  %p1561_p11 = pneg %p1931_p10  ;;  %s240_s13 = int_to_ptr.vmem [resolvable:$true] %s239_s13 }
  0x13   : > { %s229_s16 = sshll.u32 %s1828_s15, 4  ;;  %s1829_s17 = smov [#allocation7]   ;;  %s230_s16 = int_to_ptr.vmem [resolvable:$true] %s229_s16 }
  0x14   : > { %p1939_p12 = pnand %p2135_p9, %p1561_p11  ;;  %s252_s18 = sshll.u32 %s1829_s17, 4  ;;  %s253_s18 = int_to_ptr.vmem [resolvable:$true] %s252_s18 }
  0x15   : > { %s1660_s19 = scalar_lea.vmem %s240_s13, 512  ;;  %p1668_p3 = scmp.lt.s32.totalorder %s240_s13, %s240_s13 }
  0x16   : > { %p1651_p13 = pneg %p1939_p12  ;;  %p1661_p0 = scmp.ne.s32.totalorder %s240_s13, %s1660_s19 }
  0x17   : > { %p1669_p4 = scmp.lt.s32.totalorder %s1660_s19, %s1660_s19 }
  0x18   : > { %p1663_p1 = pnand %p1661_p0, %p1651_p13 }
  0x19   : > { %p1670_p7 = por %p1669_p4, %p1668_p3 }
  0x1a   : > { %p1664_p2 = pneg %p1663_p1 }
  0x1c   : > { %p1671_p8 = pnand %p1670_p7, %p1664_p2 }
  0x1e   : > { %1674 = shalt.err (!%p1671_p8)
}
  0x1f   : > { %s1830_s20 = smov 128   ;;  %s1831_s21 = smov 8  }
  0x20   : > { %1567 = dma.hbm_to_vmem [thread:$0]  (!%p1939_p12), %s2131_s4, 512, %s240_s13, [#allocation6], %s1830_s20, %s1830_s20, %s1831_s21  }
  0x21   : > { %s1686_s27 = scalar_lea.vmem %s230_s16, 128  ;;  %p1694_p2 = scmp.lt.s32.totalorder %s230_s16, %s230_s16 }
  0x22   : > { %p1687_p11 = scmp.ne.s32.totalorder %s230_s16, %s1686_s27  ;;  %p1695_p3 = scmp.lt.s32.totalorder %s1686_s27, %s1686_s27 }
  0x24   : > { %p1689_p0 = pnand %p1687_p11, %p1651_p13  ;;  %p1696_p4 = por %p1695_p3, %p1694_p2 }
  0x26   : > { %p1690_p1 = pneg %p1689_p0 }
  0x28   : > { %p1697_p7 = pnand %p1696_p4, %p1690_p1 }
  0x2a   : > { %1700 = shalt.err (!%p1697_p7)
}
  0x2b   : > { %1564 = dma.hbm_to_vmem [thread:$0]  (!%p1939_p12), %s2128_s1, 128, %s230_s16, [#allocation3]  }
  0x2c   : > { %s1712_s12 = scalar_lea.vmem %s253_s18, 512  ;;  %p1720_p0 = scmp.lt.s32.totalorder %s253_s18, %s253_s18 }
  0x2d   : > { %p1713_p8 = scmp.ne.s32.totalorder %s253_s18, %s1712_s12  ;;  %p1721_p6 = scmp.lt.s32.totalorder %s1712_s12, %s1712_s12 }
  0x2f   : > { %p1715_p9 = pnand %p1713_p8, %p1651_p13  ;;  %p1722_p5 = por %p1721_p6, %p1720_p0 }
  0x31   : > { %p1716_p11 = pneg %p1715_p9 }
  0x33   : > { %p1723_p2 = pnand %p1722_p5, %p1716_p11 }
  0x35   : > { %1726 = shalt.err (!%p1723_p2)
}
  0x36   : > { %1570 = dma.hbm_to_vmem [thread:$0]  (!%p1939_p12), %s2132_s5, 512, %s253_s18, [#allocation6], %s1830_s20, %s1830_s20, %s1831_s21  }
  0x37   : > { %s1832_s16 = smov [#allocation8]  }
  0x38   : > { %s265_s17 = sshll.u32 %s1832_s16, 4  ;;  %s266_s17 = int_to_ptr.vmem [resolvable:$true] %s265_s17 }
  0x39   : > { %s1738_s19 = scalar_lea.vmem %s266_s17, 512  ;;  %p1746_p1 = scmp.lt.s32.totalorder %s266_s17, %s266_s17 }
  0x3a   : > { %p1739_p9 = scmp.ne.s32.totalorder %s266_s17, %s1738_s19  ;;  %p1747_p3 = scmp.lt.s32.totalorder %s1738_s19, %s1738_s19 }
  0x3c   : > { %p1741_p6 = pnand %p1739_p9, %p1651_p13  ;;  %p1748_p4 = por %p1747_p3, %p1746_p1 }
  0x3e   : > { %p1742_p5 = pneg %p1741_p6 }
  0x40   : > { %p1749_p7 = pnand %p1748_p4, %p1742_p5 }
  0x42   : > { %1752 = shalt.err (!%p1749_p7)
}
  0x43   : > { %1573 = dma.hbm_to_vmem [thread:$0]  (!%p1939_p12), %s2133_s6, 512, %s266_s17, [#allocation9], %s1830_s20, %s1830_s20, %s1831_s21  }
  0x44   : > { %301 = sbr.rel (%p1931_p10) target bundleno = 1239 (0x4d7), region = 48  ;;  %p2141_p13 = scmp.eq.s32.totalorder (!%p1931_p10), %s1903_s26, 0 }
  0x49   : > { %1796 = dma.done.wait (%p2141_p13), [#allocation3], 128   ;;  %p2142_p8 = pmov %p2141_p13 }
  0x4b   : > { %1798 = vsyncadd (%p2142_p8), [#allocation3], 4294967168  ;;  %p2143_p11 = pmov %p2142_p8 }
  0x4c   : > { %p2144_p0 = pmov %p2142_p8 }
  0x4d   : > { %1800 = dma.done.wait (%p2143_p11), [#allocation6], 1024  }
  0x4e   : > { %1802 = vsyncadd (%p2144_p0), [#allocation6], 4294966272  ;;  %p2145_p2 = pmov %p2144_p0 }
  0x4f   : > { %p2146_p12 = pmov %p2144_p0 }
  0x50   : > { %1804 = dma.done.wait (%p2145_p2), [#allocation9], 512  }
  0x51   : > { %1806 = vsyncadd (%p2146_p12), [#allocation9], 4294966784  ;;  %p351_p10 = scmp.lt.s32.totalorder %s1903_s26, 1  ;;  %v1833_v0 = vmov 0.0   ;;  %vm1834_vm0 = vmmov 0   ;;  %v368_v1 = vld [vmem:[#allocation5 + $0x18] sm:$0xff] }
  0x52   : > { %1470 = vmatprep.subr.mxu0 %v1833_v0  ;;  %1481 = vmatprep.subr.mxu1 %v1833_v0  ;;  %v372_v2 = vld [vmem:[#allocation7 + $0x18] sm:$0xff]  ;;  %v367_v3 = vld [vmem:[#allocation5 + $0x10] sm:$0xff]  ;;  %v366_v5 = vld [vmem:[#allocation5 + $0x8] sm:$0xff]  ;;  %vm377_vm1 = vcmask 261120   ;;  %vm595_vm2 = vcmask 130048   ;;  %s1835_s27 = smov 96  }
  0x53   : > { %1478 = vmatprep.mubr.msk.f32.mxu0 %vm1834_vm0, %v1833_v0  ;;  %1489 = vmatprep.mubr.msk.f32.mxu1 %vm1834_vm0, %v1833_v0  ;;  %s352_s11 = scalar_select %p351_p10, %s1903_s26, 1  ;;  %v371_v4 = vld [vmem:[#allocation7 + $0x10] sm:$0xff]  ;;  %v370_v6 = vld [vmem:[#allocation7 + $0x8] sm:$0xff]  ;;  %v363_v8 = vld [vmem:[#allocation2] sm:$0xff]  ;;  %vm672_vm3 = vcmask 64512   ;;  %vm1267_vm4 = vcmask 392192  }
  0x54   : > { %1471 = vmatpush3.msra.mxu0 %v368_v1  ;;  %1482 = vmatpush3.msra.mxu1 %v372_v2  ;;  %v365_v9 = vld [vmem:[#allocation5] sm:$0xff]  ;;  %v376_v12 = vld [vmem:[#allocation8 + $0x18] sm:$0xff]  ;;  %v375_v13 = vld [vmem:[#allocation8 + $0x10] sm:$0xff]  ;;  %s1836_s29 = smov 112   ;;  %s1837_s30 = smov 80   ;;  %vm1269_vm5 = vcmask 523264  }
  0x55   : > { %s1419_s14 = sshll.u32 %s352_s11, 3  ;;  %1472 = vmatprep.subr.mxu0 %v1833_v0  ;;  %1483 = vmatprep.subr.mxu1 %v1833_v0  ;;  %v369_v10 = vld [vmem:[#allocation7] sm:$0xff]  ;;  %v374_v14 = vld [vmem:[#allocation8 + $0x8] sm:$0xff]  ;;  %s1838_s12 = smov 16  }
  0x56   : > { %s354_s23 = scalar_lea.vmem %s2127_s0, %s1419_s14  ;;  %1473 = vmatpush3.msra.mxu0 %v367_v3  ;;  %1484 = vmatpush3.msra.mxu1 %v371_v4  ;;  %v373_v15 = vld [vmem:[#allocation8] sm:$0xff]  ;;  %s1839_s13 = smov 32  }
  0x57   : > { %v362_v7 = vld [vmem:[%s354_s23] sm:$0xff]  ;;  %1474 = vmatprep.subr.mxu0 %v1833_v0  ;;  %1485 = vmatprep.subr.mxu1 %v1833_v0  ;;  %s1840_s15 = smov 48   ;;  %s348_s16 = sand.u32 1, %s1817_s3  }
  0x58   : > { %v364_v11 = vadd.f32 %v363_v8, %v362_v7  ;;  %1475 = vmatpush3.msra.mxu0 %v366_v5  ;;  %1486 = vmatpush3.msra.mxu1 %v370_v6  ;;  %s1418_s17 = sshll.u32 %s348_s16, 3  ;;  %s1436_s19 = sshll.u32 %s1903_s26, 7 }
  0x59   : > { %1476 = vmatprep.subr.mxu0 %v1833_v0  ;;  %1487 = vmatprep.subr.mxu1 %v1833_v0  ;;  %s350_s18 = scalar_lea.vmem [#allocation10], %s1418_s17  ;;  %s2092_s20 = scalar_lea.hbm %s2134_s7, %s1436_s19 }
  0x5a   : > { %1477 = vmatpush3.msra.mxu0 %v365_v9  ;;  %1488 = vmatpush3.msra.mxu1 %v369_v10  ;;  %s1285_s22 = sshll.u32 %s350_s18, 4  ;;  %s1272_s21 = scalar_lea.sflag [#allocation4], %s348_s16  ;;  %s1286_s22 = int_to_ptr.vmem [resolvable:$true] %s1285_s22 }
  0x5b   : > { %1479 = vmatmul.mubr.msk.f32.vlgmr.msra.gmra.mxu0 %vm377_vm1, %v364_v11  ;;  %1490 = vmatmul.mubr.msk.f32.vlgmr.msra.gmra.mxu1 %vm377_vm1, %v364_v11  ;;  %s1753_s23 = scalar_lea.vmem %s1286_s22, 128  ;;  %p2147_p6 = scmp.ne.s32.totalorder %s2137_s9, 0 }
  0x5c   : > { %1503 = vmatprep.subr.mxu1 %v1833_v0  ;;  %1505 = vmatprep.mubr.msk.f32.mxu1 %vm1834_vm0, %v1833_v0  ;;  %p1754_p9 = scmp.ne.s32.totalorder %s1286_s22, %s1753_s23  ;;  %s1841_s26 = smov [#allocation10]  }
  0x5d   : > { %1492 = vmatprep.subr.mxu0 %v1833_v0  ;;  %1500 = vmatprep.mubr.msk.f32.mxu0 %vm1834_vm0, %v1833_v0 }
  0x5e   : > { %1493 = vmatpush3.msra.mxu0 %v376_v12  ;;  %p1755_p5 = pnand %p1754_p9, %p2147_p6 }
  0x5f   : > { %1494 = vmatprep.subr.mxu0 %v1833_v0 }
  0x60   : > { %1495 = vmatpush3.msra.mxu0 %v375_v13  ;;  %p1756_p1 = pneg %p1755_p5 }
  0x61   : > { %1496 = vmatprep.subr.mxu0 %v1833_v0 }
  0x62   : > { %1497 = vmatpush3.msra.mxu0 %v374_v14 }
  0x63   : > { %1498 = vmatprep.subr.mxu0 %v1833_v0 }
  0x64   : > { %1499 = vmatpush3.msra.mxu0 %v373_v15 }
  0x65   : > { %1501 = vmatmul.mubr.msk.f32.vlgmr.msra.gmra.mxu0 %vm377_vm1, %v362_v7  ;;  %1513 = vmatprep.subr.mxu0 %v1833_v0 }
  0x66   : > { %1515 = vmatprep.mubr.msk.f32.mxu0 %vm1834_vm0, %v1833_v0 }
 0x11b   : > { %v447_v16 = vpop.f32.mrf.mxu0  ;;  %v518_v17 = vpop.f32.mrf.mxu1 }
 0x11c   : > { %v451_v18 = vmul.f32 0.17677669, %v447_v16  ;;  %925 = vrot.lane.b32.xlu1 %v518_v17, %s1835_s27  ;;  %759 = vrot.lane.b32.xlu0 %v518_v17, %s1836_s29 }
 0x11d   : > { %1504 = vmatpush3.xpose.msk.msra.mxu1 %vm595_vm2, %v518_v17  ;;  %v1480_v19 = vpop.f32.mrf.mxu0  ;;  %v1491_v20 = vpop.f32.mrf.mxu1 }
 0x11e   : > { %1508 = vmatprep.subr.mxu1 %v1833_v0 }
 0x120   : > { %1506 = vmatmul.mubr.msk.f32.vlgmr.msra.gmra.mxu1 %vm595_vm2, %v451_v18  ;;  %923 = vrot.lane.b32.xlu1 %v451_v18, %s1835_s27 }
 0x121   : > { %757 = vrot.lane.b32.xlu0 %v451_v18, %s1836_s29  ;;  %1510 = vmatprep.mubr.msk.f32.mxu1 %vm1834_vm0, %v1833_v0 }
 0x124   : > { %1088 = vrot.lane.b32.xlu1 %v451_v18, %s1837_s30 }
 0x125   : > { %1090 = vrot.lane.b32.xlu0 %v518_v17, %s1837_s30  ;;  %v2043_v21 = vpop.f32.mrf.mxu0 }
 0x126   : > { %1509 = vmatpush3.msra.mxu1 %v2043_v21 }
 0x127   : > { %v1502_v22 = vpop.f32.mrf.mxu0  ;;  %1518 = vmatprep.subr.mxu1 %v1833_v0 }
 0x18e   : > { %v760_v23 = vpop.permute.xlu0 %759  ;;  %v926_v24 = vpop.permute.xlu1 %925 }
 0x18f   : > { %1514 = vmatpush3.xpose.msk.msra.mxu0 %vm595_vm2, %v760_v23 }
 0x190   : > { %1523 = vmatprep.subr.mxu0 %v1833_v0 }
 0x192   : > { %v924_v26 = vpop.permute.xlu1 %923 }
 0x193   : > { %v758_v25 = vpop.permute.xlu0 %757 }
 0x194   : > { %1516 = vmatmul.mubr.msk.f32.vlgmr.msra.gmra.mxu0 %vm595_vm2, %v758_v25 }
 0x195   : > { %1524 = vmatpush3.xpose.msk.msra.mxu0 %vm595_vm2, %v926_v24  ;;  %1525 = vmatprep.mubr.msk.f32.mxu0 %vm1834_vm0, %v1833_v0 }
 0x196   : > { %1533 = vmatprep.subr.mxu0 %v1833_v0  ;;  %v1089_v28 = vpop.permute.xlu1 %1088 }
 0x197   : > { %v1091_v27 = vpop.permute.xlu0 %1090 }
 0x198   : > { %1526 = vmatmul.mubr.msk.f32.vlgmr.msra.gmra.mxu0 %vm595_vm2, %v924_v26 }
 0x199   : > { %1534 = vmatpush3.xpose.msk.msra.mxu0 %vm595_vm2, %v1091_v27  ;;  %1535 = vmatprep.mubr.msk.f32.mxu0 %vm1834_vm0, %v1833_v0 }
 0x19c   : > { %1536 = vmatmul.mubr.msk.f32.vlgmr.msra.gmra.mxu0 %vm595_vm2, %v1089_v28 }
 0x1e0   : > { %v668_v29 = vpop.f32.mrf.mxu1 }
 0x1e1   : > { %v673_v30 = vsel %vm672_vm3, %v668_v29, -inf }
 0x1e2   : > { %674 = vmax.xlane.f32.xlu0 %v673_v30  ;;  %v1507_v31 = vpop.f32.mrf.mxu1 }
 0x254   : > { %v831_v32 = vpop.f32.mrf.mxu0 }
 0x255   : > { %v835_v33 = vsel %vm672_vm3, %v831_v32, -inf }
 0x256   : > { %836 = vmax.xlane.f32.xlu1 %v835_v33  ;;  %v1517_v34 = vpop.f32.mrf.mxu0 }
 0x258   : > { %v997_v35 = vpop.f32.mrf.mxu0 }
 0x259   : > { %v1001_v36 = vsel %vm672_vm3, %v997_v35, -inf }
 0x25a   : > { %1002 = vmax.xlane.f32.xlu0 %v1001_v36  ;;  %v1527_v37 = vpop.f32.mrf.mxu0 }
 0x25c   : > { %v1162_v38 = vpop.f32.mrf.mxu0 }
 0x25d   : > { %v1166_v39 = vsel %vm672_vm3, %v1162_v38, -inf }
 0x25e   : > { %1167 = vmax.xlane.f32.xlu0 %v1166_v39  ;;  %v1537_v40 = vpop.f32.mrf.mxu0 }
 0x267   : > { %847 = vrot.lane.b32.xlu1 %v2043_v21, %s1836_s29 }
 0x26b   : > { %v675_v41 = vpop.xlane.xlu0 %674 }
 0x26c   : > { %v676_v42 = vsub.f32 %v668_v29, %v675_v41 }
 0x26e   : > { %v677_v43 = vmul.f32 1.442695, %v676_v42 }
 0x270   : > { %1633 = vpow2.f32 %v677_v43 }
 0x27d   : > { %v1634_v44 = vpop.eup %1633 }
 0x27e   : > { %v679_v45 = vsel %vm672_vm3, %v1634_v44, 0.0 }
 0x28b   : > { %680 = vadd.xlane.f32.xlu1 %v679_v45 }
 0x2df   : > { %v837_v46 = vpop.xlane.xlu1 %836 }
 0x2e0   : > { %v838_v47 = vsub.f32 %v831_v32, %v837_v46 }
 0x2e2   : > { %v839_v48 = vmul.f32 1.442695, %v838_v47 }
 0x2e3   : > { %v1003_v49 = vpop.xlane.xlu0 %1002  ;;  %v848_v61 = vpop.permute.xlu1 %847 }
 0x2e4   : > { %1635 = vpow2.f32 %v839_v48  ;;  %v1004_v50 = vsub.f32 %v997_v35, %v1003_v49 }
 0x2e6   : > { %v1005_v51 = vmul.f32 1.442695, %v1004_v50 }
 0x2e7   : > { %v1168_v52 = vpop.xlane.xlu0 %1167 }
 0x2e8   : > { %1637 = vpow2.f32 %v1005_v51  ;;  %v1169_v53 = vsub.f32 %v1162_v38, %v1168_v52 }
 0x2ea   : > { %v1170_v54 = vmul.f32 1.442695, %v1169_v53 }
 0x2ec   : > { %1639 = vpow2.f32 %v1170_v54 }
 0x2f1   : > { %v1636_v55 = vpop.eup %1635 }
 0x2f2   : > { %v841_v56 = vsel %vm672_vm3, %v1636_v55, 0.0 }
 0x2f3   : > { %842 = vadd.xlane.f32.xlu0 %v841_v56 }
 0x2f5   : > { %v1638_v57 = vpop.eup %1637 }
 0x2f6   : > { %v1007_v58 = vsel %vm672_vm3, %v1638_v57, 0.0 }
 0x2f7   : > { %1008 = vadd.xlane.f32.xlu1 %v1007_v58 }
 0x2f9   : > { %v1640_v59 = vpop.eup %1639 }
 0x2fa   : > { %v1172_v60 = vsel %vm672_vm3, %v1640_v59, 0.0 }
 0x2fb   : > { %1173 = vadd.xlane.f32.xlu0 %v1172_v60 }
 0x308   : > { %1177 = vrot.lane.b32.xlu1 %v2043_v21, %s1837_s30 }
 0x311   : > { %1012 = vrot.lane.b32.xlu0 %v2043_v21, %s1835_s27  ;;  %s1757_s27 = sshll.u32 %s1841_s26, 4  ;;  %s1758_s27 = int_to_ptr.vmem [resolvable:$false] %s1757_s27 }
 0x312   : > { %s1759_s29 = scalar_lea.vmem %s1758_s27, 256  ;;  %p1760_p3 = scmp.lt.s32.totalorder %s1286_s22, %s1758_s27 }
 0x313   : > { %p1761_p4 = scmp.lt.s32.totalorder %s1759_s29, %s1753_s23 }
 0x314   : > { %v681_v62 = vpop.xlane.xlu1 %680 }
 0x315   : > { %1641 = vrcp.f32 %v681_v62  ;;  %p1762_p7 = por %p1761_p4, %p1760_p3 }
 0x317   : > { %p1763_p13 = pnand %p1762_p7, %p1756_p1 }
 0x322   : > { %v1642_v63 = vpop.eup %1641 }
 0x323   : > { %v683_v1 = vmul.f32 %v1642_v63, %v1634_v44 }
 0x325   : > { %1511 = vmatmul.mubr.msk.f32.vlgmr.msra.gmra.mxu1 %vm672_vm3, %v683_v1 }
 0x326   : > { %1519 = vmatpush3.msra.mxu1 %v848_v61  ;;  %1520 = vmatprep.mubr.msk.f32.mxu1 %vm1834_vm0, %v1833_v0 }
 0x327   : > { %1528 = vmatprep.subr.mxu1 %v1833_v0 }
 0x37c   : > { %v843_v2 = vpop.xlane.xlu0 %842 }
 0x37d   : > { %1643 = vrcp.f32 %v843_v2 }
 0x380   : > { %v1009_v3 = vpop.xlane.xlu1 %1008 }
 0x381   : > { %1645 = vrcp.f32 %v1009_v3 }
 0x384   : > { %v1174_v4 = vpop.xlane.xlu0 %1173  ;;  %v1178_v10 = vpop.permute.xlu1 %1177 }
 0x385   : > { %1647 = vrcp.f32 %v1174_v4 }
 0x388   : > { %v1013_v7 = vpop.permute.xlu0 %1012 }
 0x38a   : > { %v1644_v5 = vpop.eup %1643 }
 0x38b   : > { %v845_v6 = vmul.f32 %v1644_v5, %v1636_v55 }
 0x38d   : > { %1521 = vmatmul.mubr.msk.f32.vlgmr.msra.gmra.mxu1 %vm672_vm3, %v845_v6 }
 0x38e   : > { %v1646_v8 = vpop.eup %1645  ;;  %1529 = vmatpush3.msra.mxu1 %v1013_v7  ;;  %1530 = vmatprep.mubr.msk.f32.mxu1 %vm1834_vm0, %v1833_v0 }
 0x38f   : > { %1538 = vmatprep.subr.mxu1 %v1833_v0  ;;  %v1011_v9 = vmul.f32 %v1646_v8, %v1638_v57 }
 0x391   : > { %1531 = vmatmul.mubr.msk.f32.vlgmr.msra.gmra.mxu1 %vm672_vm3, %v1011_v9 }
 0x392   : > { %v1648_v11 = vpop.eup %1647  ;;  %1539 = vmatpush3.msra.mxu1 %v1178_v10  ;;  %1540 = vmatprep.mubr.msk.f32.mxu1 %vm1834_vm0, %v1833_v0 }
 0x393   : > { %v1176_v12 = vmul.f32 %v1648_v11, %v1640_v59 }
 0x395   : > { %1541 = vmatmul.mubr.msk.f32.vlgmr.msra.gmra.mxu1 %vm672_vm3, %v1176_v12 }
 0x3e5   : > { %v753_v13 = vpop.f32.mrf.mxu1 }
 0x3e7   : > { %v1512_v14 = vpop.f32.mrf.mxu1 }
 0x44d   : > { %v919_v15 = vpop.f32.mrf.mxu1 }
 0x44e   : > { %1254 = vrot.lane.b32.xlu1 %v919_v15, %s1838_s12 }
 0x44f   : > { %v1522_v16 = vpop.f32.mrf.mxu1 }
 0x451   : > { %v1084_v17 = vpop.f32.mrf.mxu1 }
 0x452   : > { %1258 = vrot.lane.b32.xlu0 %v1084_v17, %s1839_s13 }
 0x453   : > { %v1532_v18 = vpop.f32.mrf.mxu1 }
 0x455   : > { %v1249_v19 = vpop.f32.mrf.mxu1 }
 0x456   : > { %1262 = vrot.lane.b32.xlu1 %v1249_v19, %s1840_s15 }
 0x457   : > { %v1542_v20 = vpop.f32.mrf.mxu1 }
 0x4c0   : > { %v1255_v0 = vpop.permute.xlu1 %1254 }
 0x4c1   : > { %v1265_v22 = vsel %vm595_vm2, %v753_v13, %v1255_v0 }
 0x4c4   : > { %v1259_v21 = vpop.permute.xlu0 %1258 }
 0x4c5   : > { %v1266_v23 = vsel %vm377_vm1, %v1265_v22, %v1259_v21 }
 0x4c8   : > { %v1263_v24 = vpop.permute.xlu1 %1262 }
 0x4c9   : > { %v1268_v25 = vsel %vm1267_vm4, %v1266_v23, %v1263_v24 }
 0x4ca   : > { %1270 = vst.msk [vmem:[%s350_s18] sm:$0xff] %vm1269_vm5, %v1268_v25 }
 0x4cb   : > { %1766 = shalt.err (!%p1763_p13)
}
 0x4cc   : > { %s1767_s30 = scalar_lea.hbm %s2092_s20, 128  ;;  %s1771_s15 = scalar_lea.hbm %s2134_s7, 256 }
 0x4cd   : > { %p1768_p8 = scmp.ne.s32.totalorder %s2092_s20, %s1767_s30  ;;  %p1772_p2 = scmp.lt.s32.totalorder %s2092_s20, %s2134_s7 }
 0x4ce   : > { %p1773_p12 = scmp.lt.s32.totalorder %s1771_s15, %s1767_s30 }
 0x4cf   : > { %p1769_p11 = pnand %p1768_p8, %p2147_p6 }
 0x4d0   : > { %p1774_p10 = por %p1773_p12, %p1772_p2 }
 0x4d1   : > { %p1770_p0 = pneg %p1769_p11 }
 0x4d3   : > { %p1775_p9 = pnand %p1774_p10, %p1770_p0 }
 0x4d5   : > { %1778 = shalt.err (!%p1775_p9)
}
 0x4d6   : > { %1559 = dma.vmem_to_hbm [thread:$0]  (%p2147_p6), %s1286_s22, 128, %s2092_s20, %s1272_s21  }
 0x4d7 PF: > { %p1586_p5 = scmp.ge.s32.totalorder %s1825_s25, 2  ;;  %s1297_s19 = sand.u32 1, %s1813_s2  }
 0x4d8   : > { %p2148_p1 = scmp.ne.s32.totalorder %s2138_s10, 0  ;;  %s1298_s18 = scalar_lea.sflag [#allocation4], %s1297_s19 }
 0x4da   : > { %p1575_p3 = pnand %p1586_p5, %p2148_p1 }
 0x4dc   : > { %p1576_p4 = pneg %p1575_p3 }
 0x4de   : > { %1808 = dma.done.wait (%p1576_p4), %s1298_s18, 128  }
 0x4df   : > { %1810 = vsyncadd (%p1576_p4), %s1298_s18, 4294967168  ;;  %p20_p7 = scmp.ge.s32.totalorder %s1907_s28, 4   ;;  %s2149_s2 = smov %s1817_s3 }
 0x4e0   : > { %s2150_s3 = smov %s1821_s24  ;;  %s2151_s24 = smov %s1918_s8 }
 0x4e1   : > { %s2152_s25 = smov %s1907_s28  ;;  %22 = sbr.rel (!%p20_p7) target bundleno = 6 (0x6), region = 106 }
 0x4e6   :  { %1303 = vsyncpa [#allocation3], 1 }
 0x4e7   :  { %1305 = vsyncpa [#allocation3 + $0x1], 1 }
 0x4e8   :  { %1306 = vsyncpa [#allocation6], 1 }
 0x4e9   :  { %1307 = vsyncpa [#allocation9], 1 }
 0x4ea   :  { %1308 = vsyncpa [#allocation4], 1 }
 0x4eb   :  { %1310 = vsyncpa [#allocation4 + $0x1], 1 }

</bundles_post_ra>
